<compile_context>
chip_gen: v5e
topology: v5e:2x2
jax: 0.10.0
libtpu: 0.0.40
codegen_flags: <defaults>
</compile_context>

<pallas_src>
import functools

import jax
import jax.numpy as jnp
from jax.experimental import pallas as pl
from jax.experimental.pallas import tpu as pltpu

_LANE = 128     # lane width (last-dim tiling unit)
_SUBLANE = 8    # sublane width (second-to-last-dim tiling unit)

_BUFFERED_WEIGHTS_OK = True  # flipped off once if pipeline_mode is rejected


def _round_up(n, m):
    return ((n + m - 1) // m) * m


def _cdiv(a, b):
    return (a + b - 1) // b


def _pad2d(a, rows, cols):
    r, c = a.shape
    if r == rows and c == cols:
        return a
    return jnp.pad(a, ((0, rows - r), (0, cols - c)))


def _tpu_info():
    """(physical VMEM bytes, #TensorCores per chip) with safe fallbacks."""
    kind = ""
    try:
        kind = (jax.devices()[0].device_kind or "").lower()
    except Exception:
        pass
    vmem = None
    try:
        info = pltpu.get_tpu_info()
        for attr in ("vmem_capacity_bytes", "vmem_size_bytes", "vmem_bytes"):
            val = getattr(info, attr, None)
            if val:
                vmem = int(val)
                break
    except Exception:
        pass
    is_v7 = "7" in kind
    if vmem is None:
        vmem = (64 if is_v7 else 128) * 1024 * 1024
    num_cores = 2 if is_v7 else 1
    return vmem, num_cores


def _metanet_kernel(x_ref, w1_ref, b1_ref, w2_ref, b2_ref, o_ref, acc_ref, *,
                    mm_dtype):
    k = pl.program_id(1)

    @pl.when(k == 0)
    def _init():
        acc_ref[...] = jnp.zeros_like(acc_ref)

    # Layer 1 on the MXU (f32 accumulation).  The operand cast happens
    # in-kernel so x never takes an extra HBM pass in the wrapper.
    h = jnp.dot(x_ref[...].astype(mm_dtype), w1_ref[...],
                preferred_element_type=jnp.float32)
    # Bias + ReLU on the VPU in f32 (v5e has no bf16 VPU path).
    h = jnp.maximum(h + b1_ref[...].astype(jnp.float32), 0.0)
    # Layer 2: accumulate the partial product over hidden blocks in f32.
    acc_ref[...] += jnp.dot(h.astype(mm_dtype), w2_ref[...],
                            preferred_element_type=jnp.float32)

    @pl.when(k == pl.num_programs(1) - 1)
    def _finalize():
        o_ref[...] = (acc_ref[...]
                      + b2_ref[...].astype(jnp.float32)).astype(o_ref.dtype)


def metanet_forward(x, w1, b1, w2, b2, *, compute_dtype="auto",
                    max_block_batch=1024, hidden_block=None):
    """Fused MetaNet forward: relu(x @ w1 + b1) @ w2 + b2.

    x  : [B, D_in]
    w1 : [D_in, D_hid]   (transposed vs. PyTorch's [D_hid, D_in])
    b1 : [1, D_hid] (or [D_hid])
    w2 : [D_hid, D_out]  (transposed vs. PyTorch's [D_out, D_hid])
    b2 : [1, D_out] (or [D_out])
    compute_dtype : "auto" (bf16 MXU operands for f32 inputs), None (input
                    dtype), or an explicit dtype (e.g. jnp.float32 for a
                    bit-tight reference path).  Accumulation is always f32.
    hidden_block  : optional forced hidden-dim tile (multiple of 128); by
                    default the hidden dim is only tiled if VMEM requires it.
    returns [B, D_out] in x.dtype.
    """
    global _BUFFERED_WEIGHTS_OK

    B, D_in = x.shape
    D_hid = w1.shape[1]
    D_out = w2.shape[1]
    out_dtype = x.dtype

    if isinstance(compute_dtype, str) and compute_dtype == "auto":
        mm_dtype = jnp.dtype(jnp.bfloat16) if x.dtype == jnp.float32 \
            else jnp.dtype(x.dtype)
    elif compute_dtype is None:
        mm_dtype = jnp.dtype(x.dtype)
    else:
        mm_dtype = jnp.dtype(compute_dtype)

    vmem_bytes, num_cores = _tpu_info()
    vmem_limit = int(vmem_bytes * 0.75)      # ~96 MiB v5e/v6e, ~48 MiB v7x
    budget = int(vmem_limit * 0.85)          # headroom for compiler scratch

    x_isz = jnp.dtype(x.dtype).itemsize
    mm_isz = mm_dtype.itemsize
    out_isz = jnp.dtype(out_dtype).itemsize

    def footprint(tb, th, n_hid):
        # Weight/bias blocks: single-buffered when VMEM-resident (constant
        # index map), double-buffered when streamed over hidden blocks.
        wbuf = 1 if n_hid == 1 else 2
        weights = (wbuf * (D_in * th + th * D_out) * mm_isz
                   + wbuf * th * 4 + D_out * 4)
        io = 2 * tb * D_in * x_isz + 2 * tb * D_out * out_isz   # x/out blocks
        interm = (tb * D_in * mm_isz              # in-kernel x cast
                  + tb * th * (4 + mm_isz)        # h (f32) + h cast
                  + 2 * tb * D_out * 4)           # acc scratch + dot2 result
        return weights + io + interm

    # ---- Batch tile --------------------------------------------------------
    TB = min(_round_up(B, _SUBLANE), _round_up(max_block_batch, _SUBLANE))
    if num_cores >= 2 and _cdiv(B, TB) < 2:
        # Guarantee >= 2 grid steps so the "parallel" batch axis can actually
        # be sharded across both TensorCores (v7x).
        TB = max(_SUBLANE, _round_up(_cdiv(B, 2), _SUBLANE))

    # ---- Hidden tile -------------------------------------------------------
    if hidden_block is not None:
        TH = max(_LANE, _round_up(hidden_block, _LANE))
    else:
        TH = D_hid                                 # single, unpadded block
    n_hid = _cdiv(D_hid, TH)

    # Shrink TB first (but keep >= 256 rows when possible).
    tb_floor = min(TB, 256)
    while TB > tb_floor and footprint(TB, TH, n_hid) > budget:
        TB = max(tb_floor, _round_up(TB // 2, _SUBLANE))
    # Tile the hidden dim if the resident weights are the problem.
    if hidden_block is None and TH > _LANE and footprint(TB, TH, n_hid) > budget:
        TH = _round_up(TH, _LANE)
        n_hid = _cdiv(D_hid, TH)
        while TH > _LANE and footprint(TB, TH, n_hid) > budget:
            TH = max(_LANE, _round_up(TH // 2, _LANE))
            n_hid = _cdiv(D_hid, TH)
    # Last resort: tiny batch tiles.
    while TB > _SUBLANE and footprint(TB, TH, n_hid) > budget:
        TB = max(_SUBLANE, _round_up(TB // 2, _SUBLANE))
    if footprint(TB, TH, n_hid) > budget:
        raise ValueError(
            "MetaNet layer does not fit in VMEM even with minimal tiles: "
            f"D_in={D_in}, D_hid={D_hid}, D_out={D_out}, budget={budget}B.")

    n_hid = _cdiv(D_hid, TH)
    D_hid_p = n_hid * TH     # hidden padded only as much as the tiling needs

    # ---- One-time weight/bias prep (pad hidden dim only; fuse pad + cast). -
    w1_p = _pad2d(w1, D_in, D_hid_p).astype(mm_dtype)
    b1_p = _pad2d(jnp.reshape(b1, (1, -1)), 1, D_hid_p).astype(jnp.float32)
    w2_p = _pad2d(w2, D_hid_p, D_out).astype(mm_dtype)
    b2_p = jnp.reshape(b2, (1, -1)).astype(jnp.float32)

    grid = (_cdiv(B, TB), n_hid)
    kernel = functools.partial(_metanet_kernel, mm_dtype=mm_dtype)

    def build_specs(use_buffered):
        def spec(shape, index_map, resident_block):
            if use_buffered and resident_block:
                # Constant-index block: keep a single VMEM-resident buffer.
                return pl.BlockSpec(shape, index_map,
                                    pipeline_mode=pl.Buffered(1))
            return pl.BlockSpec(shape, index_map)

        in_specs = [
            spec((TB, D_in), lambda i, k: (i, 0), False),         # x
            spec((D_in, TH), lambda i, k: (0, k), n_hid == 1),     # w1
            spec((1, TH), lambda i, k: (0, k), n_hid == 1),        # b1
            spec((TH, D_out), lambda i, k: (k, 0), n_hid == 1),    # w2
            spec((1, D_out), lambda i, k: (0, 0), True),           # b2
        ]
        out_specs = spec((TB, D_out), lambda i, k: (i, 0), False)
        return in_specs, out_specs

    def run(use_buffered):
        in_specs, out_specs = build_specs(use_buffered)
        return pl.pallas_call(
            kernel,
            out_shape=jax.ShapeDtypeStruct((B, D_out), out_dtype),
            grid_spec=pltpu.PrefetchScalarGridSpec(
                num_scalar_prefetch=0,
                grid=grid,
                in_specs=in_specs,
                out_specs=out_specs,
                scratch_shapes=[pltpu.VMEM((TB, D_out), jnp.float32)],
            ),
            compiler_params=pltpu.CompilerParams(
                # Batch axis independent (megacore-shardable); hidden axis is
                # a reduction into the scratch accumulator.
                dimension_semantics=("parallel", "arbitrary"),
                vmem_limit_bytes=vmem_limit,
            ),
        )(x, w1_p, b1_p, w2_p, b2_p)

    if _BUFFERED_WEIGHTS_OK:
        try:
            return run(True)
        except Exception:
            # This JAX/libtpu combo rejects pipeline_mode=pl.Buffered(1);
            # fall back to default (double-buffered) weight blocks.
            _BUFFERED_WEIGHTS_OK = False
    return run(False)


def init_metanet_params(key, input_dim, output_dim, hidden_dim=None,
                        dtype=jnp.float32):
    """Deterministic synthetic init mirroring MetaNet.__init__ shapes.

    Layer 1: normal(0, 0.01) for weight and bias (as in the PyTorch module).
    Layer 2: PyTorch-default-style uniform(-1/sqrt(fan_in), 1/sqrt(fan_in)).
    Weights are stored already transposed to [in, out] for the kernel.
    """
    if hidden_dim is None:
        hidden_dim = max(input_dim // 4, output_dim)
    k1, k2, k3, k4 = jax.random.split(key, 4)
    w1 = (0.01 * jax.random.normal(k1, (input_dim, hidden_dim))).astype(dtype)
    b1 = (0.01 * jax.random.normal(k2, (1, hidden_dim))).astype(dtype)
    bound = 1.0 / (hidden_dim ** 0.5)
    w2 = jax.random.uniform(k3, (hidden_dim, output_dim),
                            minval=-bound, maxval=bound).astype(dtype)
    b2 = jax.random.uniform(k4, (1, output_dim),
                            minval=-bound, maxval=bound).astype(dtype)
    return w1, b1, w2, b2


def metanet_ref(x, w1, b1, w2, b2):
    h = jnp.maximum(x @ w1 + b1, 0.0)
    return h @ w2 + b2


if __name__ == "__main__":
    key = jax.random.PRNGKey(0)
    kx, kp, kx2, kp2 = jax.random.split(key, 4)

    # --- Case 1: module defaults (batch=8, input_dim=32 -> hidden=8, out=4).
    batch, input_dim, output_dim = 8, 32, 4
    hidden_dim = max(input_dim // 4, output_dim)   # 8
    x = jax.random.normal(kx, (batch, input_dim), dtype=jnp.float32)
    w1, b1, w2, b2 = init_metanet_params(kp, input_dim, output_dim, hidden_dim)
    ref = metanet_ref(x, w1, b1, w2, b2)

    # Exact f32 path.
    out_f32 = jax.block_until_ready(
        metanet_forward(x, w1, b1, w2, b2, compute_dtype=jnp.float32))
    assert out_f32.shape == (batch, output_dim)
    assert jnp.allclose(out_f32, ref, atol=1e-5, rtol=1e-5)

    # Default ("auto" -> bf16 MXU operands, f32 accumulate) path.
    out_auto = jax.block_until_ready(metanet_forward(x, w1, b1, w2, b2))
    assert out_auto.shape == (batch, output_dim)
    assert jnp.allclose(out_auto, ref, atol=2e-2, rtol=2e-2)

    # --- Case 2: non-aligned batch + forced hidden-dim tiling (accumulator
    # path with partial last batch block and zero-padded hidden tail).
    batch2, input_dim2, output_dim2, hidden_dim2 = 10, 64, 4, 320
    x2 = jax.random.normal(kx2, (batch2, input_dim2), dtype=jnp.float32)
    w1b, b1b, w2b, b2b = init_metanet_params(kp2, input_dim2, output_dim2,
                                             hidden_dim2)
    ref2 = metanet_ref(x2, w1b, b1b, w2b, b2b)

    out2 = jax.block_until_ready(
        metanet_forward(x2, w1b, b1b, w2b, b2b, compute_dtype=jnp.float32,
                        hidden_block=128))
    assert out2.shape == (batch2, output_dim2)
    assert jnp.allclose(out2, ref2, atol=1e-4, rtol=1e-4)

    out2_auto = jax.block_until_ready(
        metanet_forward(x2, w1b, b1b, w2b, b2b, hidden_block=128))
    assert jnp.allclose(out2_auto, ref2, atol=2e-2, rtol=2e-2)

    print("KERNEL_OK")
</pallas_src>

<mosaic_0001>
module attributes {stable_mosaic.version = 11 : i64} {
  func.func @_metanet_kernel(%arg0: i32, %arg1: i32, %arg2: memref<8x32xf32, #tpu.memory_space<vmem>>, %arg3: memref<32x8xf32, #tpu.memory_space<vmem>>, %arg4: memref<1x8xf32, #tpu.memory_space<vmem>>, %arg5: memref<8x4xf32, #tpu.memory_space<vmem>>, %arg6: memref<1x4xf32, #tpu.memory_space<vmem>>, %arg7: memref<8x4xf32, #tpu.memory_space<vmem>>, %arg8: memref<8x4xf32, #tpu.memory_space<vmem>>) attributes {dimension_semantics = [#tpu.dimension_semantics<parallel>, #tpu.dimension_semantics<arbitrary>], iteration_bounds = array<i64: 1, 1>, scalar_prefetch = 0 : i64, scratch_operands = 1 : i64, tpu.core_type = #tpu.core_type<tc>, window_params = [{transform_indices = @transform_0, window_bounds = array<i64: 8, 32>}, {pipeline_mode = #tpu.pipeline_mode<synchronous>, transform_indices = @transform_1, window_bounds = array<i64: 32, 8>}, {pipeline_mode = #tpu.pipeline_mode<synchronous>, transform_indices = @transform_2, window_bounds = array<i64: 1, 8>}, {pipeline_mode = #tpu.pipeline_mode<synchronous>, transform_indices = @transform_3, window_bounds = array<i64: 8, 4>}, {pipeline_mode = #tpu.pipeline_mode<synchronous>, transform_indices = @transform_4, window_bounds = array<i64: 1, 4>}, {transform_indices = @transform_5, window_bounds = array<i64: 8, 4>}]} {
    %c0_i32 = arith.constant 0 : i32
    %0 = arith.cmpi eq, %arg1, %c0_i32 : i32
    %1 = arith.extui %0 : i1 to i32
    %c0_i32_0 = arith.constant 0 : i32
    %2 = arith.cmpi ne, %1, %c0_i32_0 : i32
    scf.if %2 {
      %cst_16 = arith.constant 0.000000e+00 : f32
      %19 = vector.broadcast %cst_16 : f32 to vector<8x4xf32>
      %c0_17 = arith.constant 0 : index
      %c0_18 = arith.constant 0 : index
      %20 = vector.load %arg8[%c0_17, %c0_18] : memref<8x4xf32, #tpu.memory_space<vmem>>, vector<8x4xf32>
      tpu.vector_store %arg8[%c0_17, %c0_18], %19 {strides = array<i32>} : memref<8x4xf32, #tpu.memory_space<vmem>>, vector<8x4xf32>,
    } else {
    }
    %c0 = arith.constant 0 : index
    %c0_1 = arith.constant 0 : index
    %3 = vector.load %arg2[%c0, %c0_1] : memref<8x32xf32, #tpu.memory_space<vmem>>, vector<8x32xf32>
    %c0_2 = arith.constant 0 : index
    %c0_3 = arith.constant 0 : index
    %4 = vector.load %arg3[%c0_2, %c0_3] : memref<32x8xf32, #tpu.memory_space<vmem>>, vector<32x8xf32>
    %cst = arith.constant dense<0.000000e+00> : vector<8x8xf32>
    %5 = tpu.matmul %3, %4, %cst {dimension_numbers = #tpu.dot_dimension_numbers<[1], [0], [0], [1], [0, 0, 1, 1], [], []>} : vector<8x32xf32>, vector<32x8xf32>, vector<8x8xf32> -> vector<8x8xf32>
    %c0_4 = arith.constant 0 : index
    %c0_5 = arith.constant 0 : index
    %6 = vector.load %arg4[%c0_4, %c0_5] : memref<1x8xf32, #tpu.memory_space<vmem>>, vector<1x8xf32>
    %7 = vector.broadcast %6 : vector<1x8xf32> to vector<8x8xf32>
    %8 = arith.addf %5, %7 : vector<8x8xf32>
    %cst_6 = arith.constant 0.000000e+00 : f32
    %9 = vector.broadcast %cst_6 : f32 to vector<8x8xf32>
    %10 = arith.maximumf %8, %9 : vector<8x8xf32>
    %c0_7 = arith.constant 0 : index
    %c0_8 = arith.constant 0 : index
    %11 = vector.load %arg8[%c0_7, %c0_8] : memref<8x4xf32, #tpu.memory_space<vmem>>, vector<8x4xf32>
    %c0_9 = arith.constant 0 : index
    %c0_10 = arith.constant 0 : index
    %12 = vector.load %arg5[%c0_9, %c0_10] : memref<8x4xf32, #tpu.memory_space<vmem>>, vector<8x4xf32>
    %cst_11 = arith.constant dense<0.000000e+00> : vector<8x4xf32>
    %13 = tpu.matmul %10, %12, %cst_11 {dimension_numbers = #tpu.dot_dimension_numbers<[1], [0], [0], [1], [0, 0, 1, 1], [], []>} : vector<8x8xf32>, vector<8x4xf32>, vector<8x4xf32> -> vector<8x4xf32>
    %14 = arith.addf %11, %13 : vector<8x4xf32>
    %c0_12 = arith.constant 0 : index
    %c0_13 = arith.constant 0 : index
    %15 = vector.load %arg8[%c0_12, %c0_13] : memref<8x4xf32, #tpu.memory_space<vmem>>, vector<8x4xf32>
    tpu.vector_store %arg8[%c0_12, %c0_13], %14 {strides = array<i32>} : memref<8x4xf32, #tpu.memory_space<vmem>>, vector<8x4xf32>,
    %c0_i32_14 = arith.constant 0 : i32
    %16 = arith.cmpi eq, %arg1, %c0_i32_14 : i32
    %17 = arith.extui %16 : i1 to i32
    %c0_i32_15 = arith.constant 0 : i32
    %18 = arith.cmpi ne, %17, %c0_i32_15 : i32
    scf.if %18 {
      %c0_16 = arith.constant 0 : index
      %c0_17 = arith.constant 0 : index
      %19 = vector.load %arg8[%c0_16, %c0_17] : memref<8x4xf32, #tpu.memory_space<vmem>>, vector<8x4xf32>
      %c0_18 = arith.constant 0 : index
      %c0_19 = arith.constant 0 : index
      %20 = vector.load %arg6[%c0_18, %c0_19] : memref<1x4xf32, #tpu.memory_space<vmem>>, vector<1x4xf32>
      %21 = vector.broadcast %20 : vector<1x4xf32> to vector<8x4xf32>
      %22 = arith.addf %19, %21 : vector<8x4xf32>
      %c0_20 = arith.constant 0 : index
      %c0_21 = arith.constant 0 : index
      %23 = vector.load %arg7[%c0_20, %c0_21] : memref<8x4xf32, #tpu.memory_space<vmem>>, vector<8x4xf32>
      tpu.vector_store %arg7[%c0_20, %c0_21], %22 {strides = array<i32>} : memref<8x4xf32, #tpu.memory_space<vmem>>, vector<8x4xf32>,
    } else {
    }
    return
  }
  func.func @transform_0(%arg0: i32, %arg1: i32) -> (i32, i32) {
    %c0_i32 = arith.constant 0 : i32
    %c0_i32_0 = arith.constant 0 : i32
    return %arg0, %c0_i32 : i32, i32
  }
  func.func @transform_1(%arg0: i32, %arg1: i32) -> (i32, i32) {
    %c0_i32 = arith.constant 0 : i32
    %c0_i32_0 = arith.constant 0 : i32
    return %c0_i32, %arg1 : i32, i32
  }
  func.func @transform_2(%arg0: i32, %arg1: i32) -> (i32, i32) {
    %c0_i32 = arith.constant 0 : i32
    %c0_i32_0 = arith.constant 0 : i32
    return %c0_i32, %arg1 : i32, i32
  }
  func.func @transform_3(%arg0: i32, %arg1: i32) -> (i32, i32) {
    %c0_i32 = arith.constant 0 : i32
    %c0_i32_0 = arith.constant 0 : i32
    return %arg1, %c0_i32 : i32, i32
  }
  func.func @transform_4(%arg0: i32, %arg1: i32) -> (i32, i32) {
    %c0_i32 = arith.constant 0 : i32
    %c0_i32_0 = arith.constant 0 : i32
    %c0_i32_1 = arith.constant 0 : i32
    return %c0_i32, %c0_i32_0 : i32, i32
  }
  func.func @transform_5(%arg0: i32, %arg1: i32) -> (i32, i32) {
    %c0_i32 = arith.constant 0 : i32
    %c0_i32_0 = arith.constant 0 : i32
    return %arg0, %c0_i32 : i32, i32
  }
}

module attributes {stable_mosaic.version = 11 : i64} {
  func.func @_metanet_kernel(%arg0: i32, %arg1: i32, %arg2: memref<8x32xf32, #tpu.memory_space<vmem>>, %arg3: memref<32x8xf32, #tpu.memory_space<vmem>>, %arg4: memref<1x8xf32, #tpu.memory_space<vmem>>, %arg5: memref<8x4xf32, #tpu.memory_space<vmem>>, %arg6: memref<1x4xf32, #tpu.memory_space<vmem>>, %arg7: memref<8x4xf32, #tpu.memory_space<vmem>>, %arg8: memref<8x4xf32, #tpu.memory_space<vmem>>) attributes {dimension_semantics = [#tpu.dimension_semantics<parallel>, #tpu.dimension_semantics<arbitrary>], iteration_bounds = array<i64: 1, 1>, scalar_prefetch = 0 : i64, scratch_operands = 1 : i64, tpu.core_type = #tpu.core_type<tc>, window_params = [{transform_indices = @transform_0, window_bounds = array<i64: 8, 32>}, {transform_indices = @transform_1, window_bounds = array<i64: 32, 8>}, {transform_indices = @transform_2, window_bounds = array<i64: 1, 8>}, {transform_indices = @transform_3, window_bounds = array<i64: 8, 4>}, {pipeline_mode = #tpu.pipeline_mode<synchronous>, transform_indices = @transform_4, window_bounds = array<i64: 1, 4>}, {transform_indices = @transform_5, window_bounds = array<i64: 8, 4>}]} {
    %c0_i32 = arith.constant 0 : i32
    %0 = arith.cmpi eq, %arg1, %c0_i32 : i32
    %1 = arith.extui %0 : i1 to i32
    %c0_i32_0 = arith.constant 0 : i32
    %2 = arith.cmpi ne, %1, %c0_i32_0 : i32
    scf.if %2 {
      %cst_16 = arith.constant 0.000000e+00 : f32
      %19 = vector.broadcast %cst_16 : f32 to vector<8x4xf32>
      %c0_17 = arith.constant 0 : index
      %c0_18 = arith.constant 0 : index
      %20 = vector.load %arg8[%c0_17, %c0_18] : memref<8x4xf32, #tpu.memory_space<vmem>>, vector<8x4xf32>
      tpu.vector_store %arg8[%c0_17, %c0_18], %19 {strides = array<i32>} : memref<8x4xf32, #tpu.memory_space<vmem>>, vector<8x4xf32>,
    } else {
    }
    %c0 = arith.constant 0 : index
    %c0_1 = arith.constant 0 : index
    %3 = vector.load %arg2[%c0, %c0_1] : memref<8x32xf32, #tpu.memory_space<vmem>>, vector<8x32xf32>
    %c0_2 = arith.constant 0 : index
    %c0_3 = arith.constant 0 : index
    %4 = vector.load %arg3[%c0_2, %c0_3] : memref<32x8xf32, #tpu.memory_space<vmem>>, vector<32x8xf32>
    %cst = arith.constant dense<0.000000e+00> : vector<8x8xf32>
    %5 = tpu.matmul %3, %4, %cst {dimension_numbers = #tpu.dot_dimension_numbers<[1], [0], [0], [1], [0, 0, 1, 1], [], []>} : vector<8x32xf32>, vector<32x8xf32>, vector<8x8xf32> -> vector<8x8xf32>
    %c0_4 = arith.constant 0 : index
    %c0_5 = arith.constant 0 : index
    %6 = vector.load %arg4[%c0_4, %c0_5] : memref<1x8xf32, #tpu.memory_space<vmem>>, vector<1x8xf32>
    %7 = vector.broadcast %6 : vector<1x8xf32> to vector<8x8xf32>
    %8 = arith.addf %5, %7 : vector<8x8xf32>
    %cst_6 = arith.constant 0.000000e+00 : f32
    %9 = vector.broadcast %cst_6 : f32 to vector<8x8xf32>
    %10 = arith.maximumf %8, %9 : vector<8x8xf32>
    %c0_7 = arith.constant 0 : index
    %c0_8 = arith.constant 0 : index
    %11 = vector.load %arg8[%c0_7, %c0_8] : memref<8x4xf32, #tpu.memory_space<vmem>>, vector<8x4xf32>
    %c0_9 = arith.constant 0 : index
    %c0_10 = arith.constant 0 : index
    %12 = vector.load %arg5[%c0_9, %c0_10] : memref<8x4xf32, #tpu.memory_space<vmem>>, vector<8x4xf32>
    %cst_11 = arith.constant dense<0.000000e+00> : vector<8x4xf32>
    %13 = tpu.matmul %10, %12, %cst_11 {dimension_numbers = #tpu.dot_dimension_numbers<[1], [0], [0], [1], [0, 0, 1, 1], [], []>} : vector<8x8xf32>, vector<8x4xf32>, vector<8x4xf32> -> vector<8x4xf32>
    %14 = arith.addf %11, %13 : vector<8x4xf32>
    %c0_12 = arith.constant 0 : index
    %c0_13 = arith.constant 0 : index
    %15 = vector.load %arg8[%c0_12, %c0_13] : memref<8x4xf32, #tpu.memory_space<vmem>>, vector<8x4xf32>
    tpu.vector_store %arg8[%c0_12, %c0_13], %14 {strides = array<i32>} : memref<8x4xf32, #tpu.memory_space<vmem>>, vector<8x4xf32>,
    %c0_i32_14 = arith.constant 0 : i32
    %16 = arith.cmpi eq, %arg1, %c0_i32_14 : i32
    %17 = arith.extui %16 : i1 to i32
    %c0_i32_15 = arith.constant 0 : i32
    %18 = arith.cmpi ne, %17, %c0_i32_15 : i32
    scf.if %18 {
      %c0_16 = arith.constant 0 : index
      %c0_17 = arith.constant 0 : index
      %19 = vector.load %arg8[%c0_16, %c0_17] : memref<8x4xf32, #tpu.memory_space<vmem>>, vector<8x4xf32>
      %c0_18 = arith.constant 0 : index
      %c0_19 = arith.constant 0 : index
      %20 = vector.load %arg6[%c0_18, %c0_19] : memref<1x4xf32, #tpu.memory_space<vmem>>, vector<1x4xf32>
      %21 = vector.broadcast %20 : vector<1x4xf32> to vector<8x4xf32>
      %22 = arith.addf %19, %21 : vector<8x4xf32>
      %c0_20 = arith.constant 0 : index
      %c0_21 = arith.constant 0 : index
      %23 = vector.load %arg7[%c0_20, %c0_21] : memref<8x4xf32, #tpu.memory_space<vmem>>, vector<8x4xf32>
      tpu.vector_store %arg7[%c0_20, %c0_21], %22 {strides = array<i32>} : memref<8x4xf32, #tpu.memory_space<vmem>>, vector<8x4xf32>,
    } else {
    }
    return
  }
  func.func @transform_0(%arg0: i32, %arg1: i32) -> (i32, i32) {
    %c0_i32 = arith.constant 0 : i32
    %c0_i32_0 = arith.constant 0 : i32
    return %arg0, %c0_i32 : i32, i32
  }
  func.func @transform_1(%arg0: i32, %arg1: i32) -> (i32, i32) {
    %c0_i32 = arith.constant 0 : i32
    %c0_i32_0 = arith.constant 0 : i32
    return %c0_i32, %arg1 : i32, i32
  }
  func.func @transform_2(%arg0: i32, %arg1: i32) -> (i32, i32) {
    %c0_i32 = arith.constant 0 : i32
    %c0_i32_0 = arith.constant 0 : i32
    return %c0_i32, %arg1 : i32, i32
  }
  func.func @transform_3(%arg0: i32, %arg1: i32) -> (i32, i32) {
    %c0_i32 = arith.constant 0 : i32
    %c0_i32_0 = arith.constant 0 : i32
    return %arg1, %c0_i32 : i32, i32
  }
  func.func @transform_4(%arg0: i32, %arg1: i32) -> (i32, i32) {
    %c0_i32 = arith.constant 0 : i32
    %c0_i32_0 = arith.constant 0 : i32
    %c0_i32_1 = arith.constant 0 : i32
    return %c0_i32, %c0_i32_0 : i32, i32
  }
  func.func @transform_5(%arg0: i32, %arg1: i32) -> (i32, i32) {
    %c0_i32 = arith.constant 0 : i32
    %c0_i32_0 = arith.constant 0 : i32
    return %arg0, %c0_i32 : i32, i32
  }
}

</mosaic_0001>

<bundles_post_ra>
// kernel: tpu_custom_call.1
= control target key start
LH: loop header
LB: loop body
LE: loop exit
PB: predicated region body
PF: predicated region fallthrough
CT: control target
= control target key end

     0   :  { %vm35_vm0 = vcmask 261120   ;;  %vm24_vm1 = vcmask 31744   ;;  %v108_v6 = vmov 0.0   ;;  %vm62_vm2 = vcmask 64512   ;;  %s169_s1 = inlined_call_operand.vmem [shape: f32[32,8], index: 1, kind: input, shape index: {}]   ;;  %s170_s2 = inlined_call_operand.vmem [shape: f32[1,8], index: 2, kind: input, shape index: {}]   ;;  %s171_s0 = inlined_call_operand.vmem [shape: f32[8,32], index: 0, kind: input, shape index: {}]   ;;  %s172_s4 = inlined_call_operand.vmem [shape: f32[1,4], index: 4, kind: input, shape index: {}]   ;;  %s173_s3 = inlined_call_operand.vmem [shape: f32[8,4], index: 3, kind: input, shape index: {}]   ;;  %s174_s5 = inlined_call_operand.vmem [shape: f32[8,4], index: 5, kind: output, shape index: {}]  }
   0x1   :  { %v30_v0 = vld [vmem:[%s169_s1 + $0x18] sm:$0xff]  ;;  %v29_v1 = vld [vmem:[%s169_s1 + $0x10] sm:$0xff]  ;;  %v28_v2 = vld [vmem:[%s169_s1 + $0x8] sm:$0xff]  ;;  %25 = vst.msk [vmem:[#allocation2] sm:$0xff] %vm24_vm1, %v108_v6 }
   0x2   :  { %51 = vmatpush.msra.mxu0 %v30_v0  ;;  %v27_v3 = vld [vmem:[%s169_s1] sm:$0xff] }
   0x3   :  { %v26_v4 = vld [vmem:[%s171_s0] sm:$0xff] }
   0x4   :  { %52 = vmatpush.msra.mxu0 %v29_v1  ;;  %v61_v5 = vld [vmem:[%s173_s3] sm:$0xff] }
   0x5   :  { %81 = vmatpush.msra.mxu1 %v61_v5  ;;  %v106_v7 = vld [vmem:[%s170_s2] ss:$0 sm:$0xff] }
   0x6   :  { %53 = vmatpush.msra.mxu0 %v28_v2  ;;  %v107_v14 = vld [vmem:[%s172_s4] ss:$0 sm:$0xff] }
   0x8   :  { %54 = vmatpush.msra.mxu0 %v27_v3  ;;  %v60_v11 = vld [vmem:[#allocation2] sm:$0xff] }
   0x9   :  { %103 = vmatmul.msk.f32.vlgmr.msra.gmra.mxu0 %vm35_vm0, %v26_v4 }
  0x86   :  { %v56_v8 = vpop.f32.mrf.mxu0 }
  0x87   :  { %v57_v9 = vadd.f32 %v106_v7, %v56_v8 }
  0x89   :  { %v59_v10 = vmax.f32 %v57_v9, 0.0 }
  0x8b   :  { %104 = vmatmul.msk.f32.vlgmr.msra.gmra.mxu1 %vm62_vm2, %v59_v10 }
 0x108   :  { %v83_v12 = vpop.f32.mrf.mxu1 }
 0x109   :  { %v86_v13 = vadd.f32 %v83_v12, %v60_v11 }
 0x10b   :  { %88 = vst.msk [vmem:[#allocation2] sm:$0xff] %vm24_vm1, %v86_v13 }
 0x112   :  { %v92_v15 = vld [vmem:[#allocation2] sm:$0xff] }
 0x113   :  { %v97_v16 = vadd.f32 %v107_v14, %v92_v15 }
 0x115   :  { %98 = vst.msk [vmem:[%s174_s5] sm:$0xff] %vm24_vm1, %v97_v16 }

// kernel: tpu_custom_call.1
= control target key start
LH: loop header
LB: loop body
LE: loop exit
PB: predicated region body
PF: predicated region fallthrough
CT: control target
= control target key end

     0   :  { %vm35_vm0 = vcmask 261120   ;;  %vm24_vm1 = vcmask 31744   ;;  %v108_v6 = vmov 0.0   ;;  %vm62_vm2 = vcmask 64512   ;;  %s169_s1 = inlined_call_operand.vmem [shape: f32[32,8], index: 1, kind: input, shape index: {}]   ;;  %s170_s2 = inlined_call_operand.vmem [shape: f32[1,8], index: 2, kind: input, shape index: {}]   ;;  %s171_s0 = inlined_call_operand.vmem [shape: f32[8,32], index: 0, kind: input, shape index: {}]   ;;  %s172_s4 = inlined_call_operand.vmem [shape: f32[1,4], index: 4, kind: input, shape index: {}]   ;;  %s173_s3 = inlined_call_operand.vmem [shape: f32[8,4], index: 3, kind: input, shape index: {}]   ;;  %s174_s5 = inlined_call_operand.vmem [shape: f32[8,4], index: 5, kind: output, shape index: {}]  }
   0x1   :  { %v30_v0 = vld [vmem:[%s169_s1 + $0x18] sm:$0xff]  ;;  %v29_v1 = vld [vmem:[%s169_s1 + $0x10] sm:$0xff]  ;;  %v28_v2 = vld [vmem:[%s169_s1 + $0x8] sm:$0xff]  ;;  %25 = vst.msk [vmem:[#allocation2] sm:$0xff] %vm24_vm1, %v108_v6 }
   0x2   :  { %51 = vmatpush.msra.mxu0 %v30_v0  ;;  %v27_v3 = vld [vmem:[%s169_s1] sm:$0xff] }
   0x3   :  { %v26_v4 = vld [vmem:[%s171_s0] sm:$0xff] }
   0x4   :  { %52 = vmatpush.msra.mxu0 %v29_v1  ;;  %v61_v5 = vld [vmem:[%s173_s3] sm:$0xff] }
   0x5   :  { %81 = vmatpush.msra.mxu1 %v61_v5  ;;  %v106_v7 = vld [vmem:[%s170_s2] ss:$0 sm:$0xff] }
   0x6   :  { %53 = vmatpush.msra.mxu0 %v28_v2  ;;  %v107_v14 = vld [vmem:[%s172_s4] ss:$0 sm:$0xff] }
   0x8   :  { %54 = vmatpush.msra.mxu0 %v27_v3  ;;  %v60_v11 = vld [vmem:[#allocation2] sm:$0xff] }
   0x9   :  { %103 = vmatmul.msk.f32.vlgmr.msra.gmra.mxu0 %vm35_vm0, %v26_v4 }
  0x86   :  { %v56_v8 = vpop.f32.mrf.mxu0 }
  0x87   :  { %v57_v9 = vadd.f32 %v106_v7, %v56_v8 }
  0x89   :  { %v59_v10 = vmax.f32 %v57_v9, 0.0 }
  0x8b   :  { %104 = vmatmul.msk.f32.vlgmr.msra.gmra.mxu1 %vm62_vm2, %v59_v10 }
 0x108   :  { %v83_v12 = vpop.f32.mrf.mxu1 }
 0x109   :  { %v86_v13 = vadd.f32 %v83_v12, %v60_v11 }
 0x10b   :  { %88 = vst.msk [vmem:[#allocation2] sm:$0xff] %vm24_vm1, %v86_v13 }
 0x112   :  { %v92_v15 = vld [vmem:[#allocation2] sm:$0xff] }
 0x113   :  { %v97_v16 = vadd.f32 %v107_v14, %v92_v15 }
 0x115   :  { %98 = vst.msk [vmem:[%s174_s5] sm:$0xff] %vm24_vm1, %v97_v16 }

</bundles_post_ra>
